<compile_context>
chip_gen: v7x
topology: tpu7x:2x2x1
jax: 0.10.0
libtpu: 0.0.40
codegen_flags: <defaults>
</compile_context>

<pallas_src>
import functools

import jax
import jax.numpy as jnp
import numpy as np
from jax.experimental import pallas as pl
from jax.experimental.pallas import tpu as pltpu


def _encoder_kernel(xt_ref, o_ref, stage_ref, *, freqs, include_input):
    """One lane-tile of the progressive positional encoding (feature-major).

    xt_ref:    (d, tn)                 input coordinates, transposed
    o_ref:     (out_dim, tn)           [x | sin/cos interleaved | zero tail]
    stage_ref: (2*c*d, tn) f32 scratch dense trig-argument staging buffer
    """
    d = xt_ref.shape[0]
    c = len(freqs)
    base = d if include_input else 0
    active = 2 * c * d
    out_rows = o_ref.shape[0]

    x = xt_ref[...]
    xf = x.astype(jnp.float32)
    half_pi = np.float32(np.pi / 2.0)

    # Stage the trig arguments densely, already in output-row order:
    #   rows [2*i*d, 2*i*d + d)        -> arguments of sin(f_i * x)
    #   rows [2*i*d + d, 2*i*d + 2*d)  -> arguments of cos(f_i * x) = sin(.. + pi/2)
    for i, f in enumerate(freqs):
        t = xf * np.float32(f)
        stage_ref[2 * i * d:(2 * i + 1) * d, :] = t
        stage_ref[(2 * i + 1) * d:(2 * i + 2) * d, :] = t + half_pi

    # One dense transcendental pass over every active output column.
    enc = jnp.sin(stage_ref[...])

    if include_input:
        o_ref[0:d, :] = x.astype(o_ref.dtype)
    o_ref[base:base + active, :] = enc.astype(o_ref.dtype)

    tail = out_rows - (base + active)          # progressively-disabled bands
    if tail > 0:
        o_ref[base + active:, :] = jnp.zeros((tail, o_ref.shape[1]),
                                             dtype=o_ref.dtype)


def _stage_params(num_freqs_base, num_freqs_max, log_sampling, current_stage):
    """Replicates the PyTorch freq_bands buffer + get_current_freqs() logic."""
    if log_sampling:
        freq_bands = 2.0 ** np.linspace(0.0, num_freqs_max - 1, num_freqs_max)
    else:
        freq_bands = np.linspace(1.0, 2.0 ** (num_freqs_max - 1),
                                 num_freqs_max)
    progress = current_stage / max(1, 4 - 1)
    current_freqs = num_freqs_base + int(progress *
                                         (num_freqs_max - num_freqs_base))
    current_freqs = min(current_freqs, num_freqs_max)
    return freq_bands.astype(np.float32), current_freqs


def progressive_encode(x,
                       *,
                       num_freqs_base: int = 4,
                       num_freqs_max: int = 10,
                       include_input: bool = True,
                       log_sampling: bool = True,
                       current_stage: int = 0,
                       tile_n: int = 4096,
                       feature_major_output: bool = False):
    """Pallas implementation of ProgressivePositionalEncoder.forward.

    Args:
      x: [N, input_dim] float coordinates.
      current_stage: static training stage (replaces set_current_stage()).
      feature_major_output: if True, return the kernel-native (out_dim, N)
        layout and skip the wrapper transpose (for fused consumers).
    Returns:
      [N, output_dim] (or [output_dim, N] if feature_major_output).
    """
    n, d = x.shape
    freq_bands, current_freqs = _stage_params(num_freqs_base, num_freqs_max,
                                              log_sampling, current_stage)
    assert 1 <= current_freqs <= num_freqs_max
    freqs = tuple(float(f) for f in freq_bands[:current_freqs])

    active = 2 * current_freqs * d
    out_dim = (d if include_input else 0) + 2 * num_freqs_max * d

    # Lane-axis tiling: multiple of 128, and >= 2 blocks when N allows so the
    # "parallel" grid axis can shard across v7x's two TensorCores.
    if n < 256:
        tn = n                                   # single full-extent block
    else:
        tn = min((max(tile_n, 128) // 128) * 128,
                 ((n // 2) // 128) * 128)
        tn = max(tn, 128)
    grid = pl.cdiv(n, tn)                        # ragged last block is masked

    xt = x.T                                     # (d, N): tiny relayout

    kernel = functools.partial(_encoder_kernel, freqs=freqs,
                               include_input=include_input)

    itemsize = jnp.dtype(x.dtype).itemsize
    cost = pl.CostEstimate(
        flops=2 * int(n) * active,               # scale mul + phase add
        transcendentals=int(n) * active,         # exactly one sin per element
        bytes_accessed=int(n) * (d + out_dim) * itemsize,
    )

    out_t = pl.pallas_call(
        kernel,
        out_shape=jax.ShapeDtypeStruct((out_dim, n), x.dtype),
        grid=(grid,),
        in_specs=[pl.BlockSpec((d, tn), lambda i: (0, i))],
        out_specs=pl.BlockSpec((out_dim, tn), lambda i: (0, i)),
        scratch_shapes=[pltpu.VMEM((active, tn), jnp.float32)],
        compiler_params=pltpu.CompilerParams(
            dimension_semantics=("parallel",)),
        cost_estimate=cost,
    )(xt)

    if feature_major_output:
        return out_t
    return out_t.T                               # PyTorch [N, out_dim] contract


def _reference_encode(x,
                      *,
                      num_freqs_base: int = 4,
                      num_freqs_max: int = 10,
                      include_input: bool = True,
                      log_sampling: bool = True,
                      current_stage: int = 0):
    """Pure-JAX reference matching the PyTorch forward exactly."""
    freq_bands, current_freqs = _stage_params(num_freqs_base, num_freqs_max,
                                              log_sampling, current_stage)
    pieces = [x] if include_input else []
    for i in range(current_freqs):
        t = x * jnp.float32(freq_bands[i])
        pieces.append(jnp.sin(t))
        pieces.append(jnp.cos(t))
    for _ in range(current_freqs, num_freqs_max):
        pieces.append(jnp.zeros_like(x))
        pieces.append(jnp.zeros_like(x))
    return jnp.concatenate(pieces, axis=-1)


if __name__ == "__main__":
    key = jax.random.PRNGKey(0)
    k0, k1, k2 = jax.random.split(key, 3)
    D = 3

    # Case 1: stage 0 (4 of 10 bands active -> zero tail), single-block path.
    N0 = 64
    x0 = jax.random.uniform(k0, (N0, D), dtype=jnp.float32,
                            minval=-1.0, maxval=1.0)
    out0 = jax.block_until_ready(progressive_encode(x0, current_stage=0))
    ref0 = jax.block_until_ready(_reference_encode(x0, current_stage=0))
    assert out0.shape == (N0, 63), out0.shape
    np.testing.assert_allclose(np.asarray(out0), np.asarray(ref0),
                               rtol=1e-5, atol=1e-5)

    # Case 2: stage 3 (all 10 bands), multi-block grid with a ragged last
    # block (N=300, tn=128 -> grid=3, last block has 44 valid lanes).
    N1 = 300
    x1 = jax.random.uniform(k1, (N1, D), dtype=jnp.float32,
                            minval=-1.0, maxval=1.0)
    out1 = jax.block_until_ready(progressive_encode(x1, current_stage=3,
                                                    tile_n=128))
    ref1 = jax.block_until_ready(_reference_encode(x1, current_stage=3))
    assert out1.shape == (N1, 63), out1.shape
    # Top band is 2**9: cos columns use sin(t + pi/2) (single dense trig pass),
    # whose pi/2 addition rounds by <= ulp(512)/2 ~ 3e-5 in the argument, and
    # Pallas-vs-XLA sin range reduction differs by a few ulp at |t| ~ 512.
    np.testing.assert_allclose(np.asarray(out1), np.asarray(ref1),
                               rtol=1e-3, atol=3e-4)

    # Case 3: include_input=False, linear frequency sampling, mid stage.
    N2 = 40
    x2 = jax.random.uniform(k2, (N2, D), dtype=jnp.float32,
                            minval=-1.0, maxval=1.0)
    out2 = jax.block_until_ready(progressive_encode(
        x2, include_input=False, log_sampling=False, current_stage=2))
    ref2 = jax.block_until_ready(_reference_encode(
        x2, include_input=False, log_sampling=False, current_stage=2))
    assert out2.shape == (N2, 60), out2.shape
    np.testing.assert_allclose(np.asarray(out2), np.asarray(ref2),
                               rtol=1e-3, atol=3e-4)

    print("KERNEL_OK")
</pallas_src>

<mosaic_0001>
module attributes {stable_mosaic.version = 11 : i64} {
  func.func @_encoder_kernel(%arg0: i32, %arg1: memref<3x64xf32, #tpu.memory_space<vmem>>, %arg2: memref<63x64xf32, #tpu.memory_space<vmem>>, %arg3: memref<24x64xf32, #tpu.memory_space<vmem>>) attributes {dimension_semantics = [#tpu.dimension_semantics<parallel>], iteration_bounds = array<i64: 1>, scalar_prefetch = 0 : i64, scratch_operands = 1 : i64, tpu.core_type = #tpu.core_type<tc>, window_params = [{transform_indices = @transform_0, window_bounds = array<i64: 3, 64>}, {transform_indices = @transform_1, window_bounds = array<i64: 63, 64>}]} {
    %c0 = arith.constant 0 : index
    %c0_0 = arith.constant 0 : index
    %0 = vector.load %arg1[%c0, %c0_0] : memref<3x64xf32, #tpu.memory_space<vmem>>, vector<3x64xf32>
    %cst = arith.constant 1.000000e+00 : f32
    %1 = vector.broadcast %cst : f32 to vector<3x64xf32>
    %2 = arith.mulf %0, %1 : vector<3x64xf32>
    %c0_1 = arith.constant 0 : index
    %c0_2 = arith.constant 0 : index
    %3 = vector.load %arg3[%c0_1, %c0_2] : memref<24x64xf32, #tpu.memory_space<vmem>>, vector<3x64xf32>
    tpu.vector_store %arg3[%c0_1, %c0_2], %2 {strides = array<i32>} : memref<24x64xf32, #tpu.memory_space<vmem>>, vector<3x64xf32>,
    %cst_3 = arith.constant 1.57079637 : f32
    %4 = vector.broadcast %cst_3 : f32 to vector<3x64xf32>
    %5 = arith.addf %2, %4 : vector<3x64xf32>
    %c3 = arith.constant 3 : index
    %c0_4 = arith.constant 0 : index
    %6 = vector.load %arg3[%c3, %c0_4] : memref<24x64xf32, #tpu.memory_space<vmem>>, vector<3x64xf32>
    tpu.vector_store %arg3[%c3, %c0_4], %5 {strides = array<i32>} : memref<24x64xf32, #tpu.memory_space<vmem>>, vector<3x64xf32>,
    %cst_5 = arith.constant 2.000000e+00 : f32
    %7 = vector.broadcast %cst_5 : f32 to vector<3x64xf32>
    %8 = arith.mulf %0, %7 : vector<3x64xf32>
    %c6 = arith.constant 6 : index
    %c0_6 = arith.constant 0 : index
    %9 = vector.load %arg3[%c6, %c0_6] : memref<24x64xf32, #tpu.memory_space<vmem>>, vector<3x64xf32>
    tpu.vector_store %arg3[%c6, %c0_6], %8 {strides = array<i32>} : memref<24x64xf32, #tpu.memory_space<vmem>>, vector<3x64xf32>,
    %cst_7 = arith.constant 1.57079637 : f32
    %10 = vector.broadcast %cst_7 : f32 to vector<3x64xf32>
    %11 = arith.addf %8, %10 : vector<3x64xf32>
    %c9 = arith.constant 9 : index
    %c0_8 = arith.constant 0 : index
    %12 = vector.load %arg3[%c9, %c0_8] : memref<24x64xf32, #tpu.memory_space<vmem>>, vector<3x64xf32>
    tpu.vector_store %arg3[%c9, %c0_8], %11 {strides = array<i32>} : memref<24x64xf32, #tpu.memory_space<vmem>>, vector<3x64xf32>,
    %cst_9 = arith.constant 4.000000e+00 : f32
    %13 = vector.broadcast %cst_9 : f32 to vector<3x64xf32>
    %14 = arith.mulf %0, %13 : vector<3x64xf32>
    %c12 = arith.constant 12 : index
    %c0_10 = arith.constant 0 : index
    %15 = vector.load %arg3[%c12, %c0_10] : memref<24x64xf32, #tpu.memory_space<vmem>>, vector<3x64xf32>
    tpu.vector_store %arg3[%c12, %c0_10], %14 {strides = array<i32>} : memref<24x64xf32, #tpu.memory_space<vmem>>, vector<3x64xf32>,
    %cst_11 = arith.constant 1.57079637 : f32
    %16 = vector.broadcast %cst_11 : f32 to vector<3x64xf32>
    %17 = arith.addf %14, %16 : vector<3x64xf32>
    %c15 = arith.constant 15 : index
    %c0_12 = arith.constant 0 : index
    %18 = vector.load %arg3[%c15, %c0_12] : memref<24x64xf32, #tpu.memory_space<vmem>>, vector<3x64xf32>
    tpu.vector_store %arg3[%c15, %c0_12], %17 {strides = array<i32>} : memref<24x64xf32, #tpu.memory_space<vmem>>, vector<3x64xf32>,
    %cst_13 = arith.constant 8.000000e+00 : f32
    %19 = vector.broadcast %cst_13 : f32 to vector<3x64xf32>
    %20 = arith.mulf %0, %19 : vector<3x64xf32>
    %c18 = arith.constant 18 : index
    %c0_14 = arith.constant 0 : index
    %21 = vector.load %arg3[%c18, %c0_14] : memref<24x64xf32, #tpu.memory_space<vmem>>, vector<3x64xf32>
    tpu.vector_store %arg3[%c18, %c0_14], %20 {strides = array<i32>} : memref<24x64xf32, #tpu.memory_space<vmem>>, vector<3x64xf32>,
    %cst_15 = arith.constant 1.57079637 : f32
    %22 = vector.broadcast %cst_15 : f32 to vector<3x64xf32>
    %23 = arith.addf %20, %22 : vector<3x64xf32>
    %c21 = arith.constant 21 : index
    %c0_16 = arith.constant 0 : index
    %24 = vector.load %arg3[%c21, %c0_16] : memref<24x64xf32, #tpu.memory_space<vmem>>, vector<3x64xf32>
    tpu.vector_store %arg3[%c21, %c0_16], %23 {strides = array<i32>} : memref<24x64xf32, #tpu.memory_space<vmem>>, vector<3x64xf32>,
    %c0_17 = arith.constant 0 : index
    %c0_18 = arith.constant 0 : index
    %25 = vector.load %arg3[%c0_17, %c0_18] : memref<24x64xf32, #tpu.memory_space<vmem>>, vector<24x64xf32>
    %26 = math.sin %25 : vector<24x64xf32>
    %c0_19 = arith.constant 0 : index
    %c0_20 = arith.constant 0 : index
    %27 = vector.load %arg2[%c0_19, %c0_20] : memref<63x64xf32, #tpu.memory_space<vmem>>, vector<3x64xf32>
    tpu.vector_store %arg2[%c0_19, %c0_20], %0 {strides = array<i32>} : memref<63x64xf32, #tpu.memory_space<vmem>>, vector<3x64xf32>,
    %c3_21 = arith.constant 3 : index
    %c0_22 = arith.constant 0 : index
    %28 = vector.load %arg2[%c3_21, %c0_22] : memref<63x64xf32, #tpu.memory_space<vmem>>, vector<24x64xf32>
    tpu.vector_store %arg2[%c3_21, %c0_22], %26 {strides = array<i32>} : memref<63x64xf32, #tpu.memory_space<vmem>>, vector<24x64xf32>,
    %cst_23 = arith.constant 0.000000e+00 : f32
    %29 = vector.broadcast %cst_23 : f32 to vector<36x64xf32>
    %c27 = arith.constant 27 : index
    %c0_24 = arith.constant 0 : index
    %30 = vector.load %arg2[%c27, %c0_24] : memref<63x64xf32, #tpu.memory_space<vmem>>, vector<36x64xf32>
    tpu.vector_store %arg2[%c27, %c0_24], %29 {strides = array<i32>} : memref<63x64xf32, #tpu.memory_space<vmem>>, vector<36x64xf32>,
    return
  }
  func.func @transform_0(%arg0: i32) -> (i32, i32) {
    %c0_i32 = arith.constant 0 : i32
    %c0_i32_0 = arith.constant 0 : i32
    return %c0_i32, %arg0 : i32, i32
  }
  func.func @transform_1(%arg0: i32) -> (i32, i32) {
    %c0_i32 = arith.constant 0 : i32
    %c0_i32_0 = arith.constant 0 : i32
    return %c0_i32, %arg0 : i32, i32
  }
}

</mosaic_0001>

<bundles_post_ra>
// kernel: tpu_custom_call.1
= control target key start
LH: loop header
LB: loop body
LE: loop exit
PB: predicated region body
PF: predicated region fallthrough
CT: control target
= control target key end

     0   :  { %6 = vsyncpa [#allocation4], 0  ;;  %s721_s0 = inlined_call_operand.hbm [shape: f32[3,64], index: 0, kind: input, shape index: {}]   ;;  %s722_s1 = inlined_call_operand.hbm [shape: f32[63,64], index: 1, kind: output, shape index: {}]  }
   0x1   :  { %7 = vsyncpa [#allocation5], 0  ;;  %s476_s6 = smov [#allocation3]   ;;  %s428_s10 = scalar_lea.hbm %s721_s0, 64 }
   0x2   :  { %s14_s7 = sshll.u32 %s476_s6, 4  ;;  %p429_p0 = scmp.ne.s32.totalorder %s721_s0, %s428_s10  ;;  %s15_s7 = int_to_ptr.vmem [resolvable:$true] %s14_s7 }
   0x3   :  { %p432_p1 = scmp.lt.u32.totalorder %s428_s10, %s721_s0 }
   0x5   :  { %p434_p2 = pnand %p432_p1, %p429_p0 }
   0x7   :  { %437 = shalt.err (!%p434_p2)
}
   0x8   :  { %s438_s15 = scalar_lea.vmem %s15_s7, 64  ;;  %p443_p4 = scmp.lt.s32.totalorder %s15_s7, %s15_s7 }
   0x9   :  { %p439_p3 = scmp.ne.s32.totalorder %s15_s7, %s438_s15  ;;  %p444_p5 = scmp.lt.s32.totalorder %s438_s15, %s438_s15 }
   0xb   :  { %p445_p6 = por %p444_p5, %p443_p4 }
   0xd   :  { %p446_p7 = pnand %p445_p6, %p439_p3 }
   0xf   :  { %449 = shalt.err (!%p446_p7)
}
  0x10   :  { %17 = dma.hbm_to_vmem [thread:$0]  %s721_s0, 64, %s15_s7, [#allocation4]  }
  0x11   :  { %472 = dma.done.wait [#allocation4], 64  }
  0x12   :  { %473 = vsyncadd [#allocation4], 4294967232  ;;  %vm22_vm0 = vcmask 518144   ;;  %vm354_vm1 = vcmask 523264   ;;  %vm362_vm2 = vcmask 519168   ;;  %v477_v0 = vmov 0.0  }
  0x13   :  { %358 = vst.msk [vmem:[#allocation6 + $0x1b] sm:$0xff] %vm354_vm1, %v477_v0  ;;  %359 = vst.msk [vmem:[#allocation6 + $0x23] sm:$0xff] %vm354_vm1, %v477_v0  ;;  %v21_v1 = vld [vmem:[#allocation3] sm:$0x7]  ;;  %v478_v35 = vmov 683565275  }
  0x14   :  { %360 = vst.msk [vmem:[#allocation6 + $0x2b] sm:$0xff] %vm354_vm1, %v477_v0  ;;  %361 = vst.msk [vmem:[#allocation6 + $0x33] sm:$0xff] %vm354_vm1, %v477_v0  ;;  %v24_v2 = vadd.f32 1.5707964, %v21_v1  ;;  %v26_v3 = vmul.f32 2.0, %v21_v1  ;;  %v30_v4 = vmul.f32 4.0, %v21_v1 }
  0x15   :  { %363 = vst.msk [vmem:[#allocation6 + $0x3b] sm:$0xf] %vm362_vm2, %v477_v0  ;;  %v34_v5 = vmul.f32 8.0, %v21_v1  ;;  %v479_v37 = vmov 2475754826   ;;  %s484_s0 = smov [#allocation6]  }
  0x16   :  { %23 = vst.msk [vmem:[#allocation2] sm:$0x7] %vm22_vm0, %v21_v1  ;;  %353 = vst.msk [vmem:[#allocation6] sm:$0x7] %vm22_vm0, %v21_v1  ;;  %v28_v6 = vadd.f32 1.5707964, %v26_v3 }
  0x17   :  { %25 = vst.msk [vmem:[#allocation2 + $0x3] sm:$0x7] %vm22_vm0, %v24_v2  ;;  %27 = vst.msk [vmem:[#allocation2 + $0x6] sm:$0x7] %vm22_vm0, %v26_v3  ;;  %v32_v7 = vadd.f32 1.5707964, %v30_v4 }
  0x18   :  { %31 = vst.msk [vmem:[#allocation2 + $0xc] sm:$0x7] %vm22_vm0, %v30_v4  ;;  %35 = vst.msk [vmem:[#allocation2 + $0x12] sm:$0x7] %vm22_vm0, %v34_v5  ;;  %v36_v8 = vadd.f32 1.5707964, %v34_v5 }
  0x19   :  { %29 = vst.msk [vmem:[#allocation2 + $0x9] sm:$0x7] %vm22_vm0, %v28_v6  ;;  %33 = vst.msk [vmem:[#allocation2 + $0xf] sm:$0x7] %vm22_vm0, %v32_v7  ;;  %v480_v39 = vmov 2131351028  }
  0x1a   :  { %37 = vst.msk [vmem:[#allocation2 + $0x15] sm:$0x7] %vm22_vm0, %v36_v8  ;;  %v481_v41 = vmov 2102212464   ;;  %v482_v43 = vmov 920167782  }
  0x1b   :  { %v483_v50 = vmov 1326507024   ;;  %s369_s18 = sshll.u32 %s484_s0, 4  ;;  %s370_s18 = int_to_ptr.vmem [resolvable:$true] %s369_s18 }
  0x1c   :  { %s450_s19 = scalar_lea.vmem %s370_s18, 1024  ;;  %p455_p9 = scmp.lt.s32.totalorder %s370_s18, %s370_s18 }
  0x1d   :  { %p451_p8 = scmp.ne.s32.totalorder %s370_s18, %s450_s19  ;;  %p456_p10 = scmp.lt.s32.totalorder %s450_s19, %s450_s19 }
  0x1e   :  { %v522_v9 = vld [vmem:[#allocation2] sm:$0xff] }
  0x1f   :  { %v41_v10 = vand.u32 2147483647, %v522_v9  ;;  %v44_v11 = vand.u32 2139095040, %v522_v9  ;;  %p457_p11 = por %p456_p10, %p455_p9 }
  0x20   :  { %v526_v12 = vld [vmem:[#allocation2 + $0x8] sm:$0xff] }
  0x21   :  { %v528_v13 = vld [vmem:[#allocation2 + $0x10] sm:$0xff]  ;;  %v45_v14 = vshrl.u32 %v44_v11, 23  ;;  %v48_v15 = vand.u32 8388607, %v41_v10  ;;  %v145_v16 = vand.u32 2147483647, %v526_v12  ;;  %p458_p12 = pnand %p457_p11, %p451_p8 }
  0x22   :  { %v148_v17 = vand.u32 2139095040, %v526_v12  ;;  %v252_v19 = vand.u32 2139095040, %v528_v13 }
  0x23   :  { %v381_v18 = vadd.s32 4294967169, %v45_v14  ;;  %v152_v21 = vand.u32 8388607, %v145_v16  ;;  %v49_v23 = vor.u32 8388608, %v48_v15 }
  0x24   :  { %v149_v20 = vshrl.u32 %v148_v17, 23  ;;  %v253_v26 = vshrl.u32 %v252_v19, 23 }
  0x25   :  { %v51_v22 = vadd.s32 1, %v381_v18  ;;  %v153_v25 = vor.u32 8388608, %v152_v21  ;;  %v537_v31 = vshll.u32 %v49_v23, 8 }
  0x26   :  { %v385_v24 = vadd.s32 4294967169, %v149_v20  ;;  %v389_v33 = vadd.s32 4294967169, %v253_v26 }
  0x27   :  { %vm52_vm3 = vcmp.gt.s32.totalorder %v51_v22, 0  ;;  %v539_v32 = vshll.u32 %v153_v25, 8 }
  0x28   :  { %v53_v27 = vsel %vm52_vm3, %v51_v22, 0  ;;  %v155_v28 = vadd.s32 1, %v385_v24  ;;  %v259_v6 = vadd.s32 1, %v389_v33 }
  0x29   :  { %v54_v29 = vshrl.u32 %v53_v27, 5  ;;  %v55_v30 = vand.u32 31, %v53_v27 }
  0x2a   :  { %vm156_vm5 = vcmp.gt.s32.totalorder %v155_v28, 0  ;;  %vm260_vm14 = vcmp.gt.s32.totalorder %v259_v6, 0 }
  0x2b   :  { %v56_v34 = vsub.s32 32, %v55_v30  ;;  %v58_v36 = vshll.u32 %v478_v35, %v55_v30  ;;  %v61_v38 = vshll.u32 %v479_v37, %v55_v30  ;;  %v64_v40 = vshll.u32 %v480_v39, %v55_v30 }
  0x2c   :  { %v67_v42 = vshll.u32 %v481_v41, %v55_v30  ;;  %v70_v44 = vshll.u32 %v482_v43, %v55_v30  ;;  %vm73_vm4 = vcmp.lt.s32.totalorder %v54_v29, 1  ;;  %vm74_vm6 = vcmp.lt.s32.totalorder %v54_v29, 2 }
  0x2d   :  { %v57_v45 = vshrl.u32 %v478_v35, %v56_v34  ;;  %v59_v46 = vshrl.u32 %v479_v37, %v56_v34  ;;  %v62_v47 = vshrl.u32 %v480_v39, %v56_v34  ;;  %v65_v48 = vshrl.u32 %v481_v41, %v56_v34 }
  0x2e   :  { %v68_v49 = vshrl.u32 %v482_v43, %v56_v34  ;;  %v71_v51 = vshrl.u32 %v483_v50, %v56_v34  ;;  %vm75_vm7 = vcmp.lt.s32.totalorder %v54_v29, 3  ;;  %v157_v55 = vsel %vm156_vm5, %v155_v28, 0 }
  0x2f   :  { %v60_v52 = vor.u32 %v59_v46, %v58_v36  ;;  %v63_v53 = vor.u32 %v62_v47, %v61_v38  ;;  %v66_v54 = vor.u32 %v65_v48, %v64_v40  ;;  %vm76_vm8 = vcmp.lt.s32.totalorder %v54_v29, 4 }
  0x30   :  { %v69_v56 = vor.u32 %v68_v49, %v67_v42  ;;  %v72_v57 = vor.u32 %v71_v51, %v70_v44  ;;  %v159_v58 = vand.u32 31, %v157_v55  ;;  %v158_v11 = vshrl.u32 %v157_v55, 5 }
  0x31   :  { %v77_v59 = vsel %vm73_vm4, %v57_v45, %v60_v52  ;;  %v78_v60 = vsel %vm76_vm8, %v66_v54, 2102212464  ;;  %v81_v61 = vsel %vm73_vm4, %v60_v52, %v63_v53  ;;  %v85_v62 = vsel %vm73_vm4, %v63_v53, %v66_v54 }
  0x32   :  { %v79_v63 = vsel %vm75_vm7, %v63_v53, %v78_v60  ;;  %v82_v0 = vsel %vm76_vm8, %v69_v56, 920167782  ;;  %v86_v1 = vsel %vm76_vm8, %v72_v57, 1326507024  ;;  %v160_v2 = vsub.s32 32, %v159_v58 }
  0x33   :  { %v80_v3 = vsel %vm74_vm6, %v77_v59, %v79_v63  ;;  %v83_v4 = vsel %vm75_vm7, %v66_v54, %v82_v0  ;;  %v87_v5 = vsel %vm75_vm7, %v69_v56, %v86_v1  ;;  %v162_v14 = vshll.u32 %v478_v35, %v159_v58 }
  0x34   :  { %v84_v7 = vsel %vm74_vm6, %v81_v61, %v83_v4  ;;  %v88_v8 = vsel %vm74_vm6, %v85_v62, %v87_v5  ;;  %v96_v20 = vmul.u32 %v537_v31, %v80_v3  ;;  %v163_v21 = vshrl.u32 %v479_v37, %v160_v2 }
  0x35   :  { %v563_v15 = vmul.u32.u64.low %v537_v31, %v88_v8  ;;  %v564_v17 = vmul.u32.u64.high %v537_v31, %v88_v8, %v563_v15  ;;  %v567_v18 = vmul.u32.u64.low %v537_v31, %v84_v7  ;;  %v568_v19 = vmul.u32.u64.high %v537_v31, %v84_v7, %v567_v18 }
  0x36   :  { %v165_v22 = vshll.u32 %v479_v37, %v159_v58  ;;  %v166_v23 = vshrl.u32 %v480_v39, %v160_v2  ;;  %v168_v24 = vshll.u32 %v480_v39, %v159_v58  ;;  %v169_v25 = vshrl.u32 %v481_v41, %v160_v2 }
  0x37   :  { %v171_v26 = vshll.u32 %v481_v41, %v159_v58  ;;  %v172_v27 = vshrl.u32 %v482_v43, %v160_v2  ;;  %v164_v28 = vor.u32 %v163_v21, %v162_v14  ;;  %v174_v30 = vshll.u32 %v482_v43, %v159_v58 }
  0x38   :  { %v167_v29 = vor.u32 %v166_v23, %v165_v22  ;;  %v175_v31 = vshrl.u32 %v483_v50, %v160_v2  ;;  %vm98_vm9 = vc.u32 %v564_v17, %v567_v18  ;;  %v99_v33 = vadd.s32 1, %v568_v19 }
  0x39   :  { %v161_v34 = vshrl.u32 %v478_v35, %v160_v2  ;;  %v170_v36 = vor.u32 %v169_v25, %v168_v24  ;;  %v173_v38 = vor.u32 %v172_v27, %v171_v26  ;;  %vm177_vm10 = vcmp.lt.s32.totalorder %v158_v11, 1 }
  0x3a   :  { %v176_v40 = vor.u32 %v175_v31, %v174_v30  ;;  %vm178_vm11 = vcmp.lt.s32.totalorder %v158_v11, 2  ;;  %v100_v42 = vsel %vm98_vm9, %v99_v33, %v568_v19  ;;  %vm179_vm12 = vcmp.lt.s32.totalorder %v158_v11, 3 }
  0x3b   :  { %vm180_vm13 = vcmp.lt.s32.totalorder %v158_v11, 4  ;;  %v185_v44 = vsel %vm177_vm10, %v164_v28, %v167_v29  ;;  %v101_v45 = vadd.s32 %v100_v42, %v96_v20  ;;  %v189_v48 = vsel %vm177_vm10, %v167_v29, %v170_v36 }
  0x3c   :  { %v182_v46 = vsel %vm180_vm13, %v170_v36, 2102212464  ;;  %v186_v47 = vsel %vm180_vm13, %v173_v38, 920167782  ;;  %v181_v49 = vsel %vm177_vm10, %v161_v34, %v164_v28  ;;  %v190_v52 = vsel %vm180_vm13, %v176_v40, 1326507024 }
  0x3d   :  { %v187_v51 = vsel %vm179_vm12, %v170_v36, %v186_v47  ;;  %v102_v53 = vadd.s32 536870912, %v101_v45  ;;  %v183_v54 = vsel %vm179_vm12, %v167_v29, %v182_v46  ;;  %v191_v56 = vsel %vm179_vm12, %v173_v38, %v190_v52 }
  0x3e   :  { %v188_v55 = vsel %vm178_vm11, %v185_v44, %v187_v51  ;;  %v192_v57 = vsel %vm178_vm11, %v189_v48, %v191_v56  ;;  %v261_v63 = vsel %vm260_vm14, %v259_v6, 0  ;;  %v184_v0 = vsel %vm178_vm11, %v181_v49, %v183_v54 }
  0x3f   :  { %v589_v58 = vmul.u32.u64.low %v539_v32, %v188_v55  ;;  %v590_v59 = vmul.u32.u64.high %v539_v32, %v188_v55, %v589_v58  ;;  %v593_v60 = vshrl.u32 %v102_v53, 30  ;;  %v263_v1 = vand.u32 31, %v261_v63 }
  0x40   :  { %v596_v61 = vmul.u32.u64.low %v539_v32, %v192_v57  ;;  %v597_v62 = vmul.u32.u64.high %v539_v32, %v192_v57, %v596_v61  ;;  %v249_v3 = vand.u32 2147483647, %v528_v13  ;;  %v200_v7 = vmul.u32 %v539_v32, %v184_v0 }
  0x41   :  { %v104_v2 = vshll.u32 %v593_v60, 30  ;;  %v203_v4 = vadd.s32 1, %v590_v59  ;;  %v264_v8 = vsub.s32 32, %v263_v1  ;;  %v609_v21 = vshrl.u32 %v261_v63, 5 }
  0x42   :  { %vm202_vm15 = vc.u32 %v597_v62, %v589_v58  ;;  %v256_v11 = vand.u32 8388607, %v249_v3  ;;  %v275_v24 = vshll.u32 %v481_v41, %v263_v1  ;;  %v266_v28 = vshll.u32 %v478_v35, %v263_v1 }
  0x43   :  { %v105_v5 = vsub.s32 %v101_v45, %v104_v2  ;;  %v204_v14 = vsel %vm202_vm15, %v203_v4, %v590_v59  ;;  %v267_v22 = vshrl.u32 %v479_v37, %v264_v8  ;;  %v270_v23 = vshrl.u32 %v480_v39, %v264_v8 }
  0x44   :  { %v205_v6 = vadd.s32 %v204_v14, %v200_v7  ;;  %v273_v32 = vshrl.u32 %v481_v41, %v264_v8  ;;  %v276_v25 = vshrl.u32 %v482_v43, %v264_v8  ;;  %v257_v27 = vor.u32 8388608, %v256_v11 }
  0x45   :  { %v107_v15 = vsub.s32 0, %v105_v5  ;;  %v279_v29 = vshrl.u32 %v483_v50, %v264_v8  ;;  %v269_v31 = vshll.u32 %v479_v37, %v263_v1  ;;  %v272_v33 = vshll.u32 %v480_v39, %v263_v1 }
  0x46   :  { %v206_v20 = vadd.s32 536870912, %v205_v6  ;;  %v277_v34 = vor.u32 %v276_v25, %v275_v24  ;;  %v268_v38 = vor.u32 %v267_v22, %v266_v28  ;;  %v278_v40 = vshll.u32 %v482_v43, %v263_v1 }
  0x47   :  { %v382_v19 = vmin.u32 %v107_v15, %v105_v5  ;;  %v271_v42 = vor.u32 %v270_v23, %v269_v31  ;;  %v274_v44 = vor.u32 %v273_v32, %v272_v33  ;;  %vm284_vm0 = vcmp.lt.s32.totalorder %v609_v21, 4 }
  0x48   :  { %v618_v30 = vshrl.u32 %v206_v20, 30  ;;  %v280_v45 = vor.u32 %v279_v29, %v278_v40  ;;  %v290_v50 = vsel %vm284_vm0, %v277_v34, 920167782  ;;  %v297_v46 = vshll.u32 %v257_v27, 8 }
  0x49   :  { %v109_v26 = vclz %v382_v19  ;;  %v97_v37 = vadd.s32 %v567_v18, %v564_v17  ;;  %v265_v48 = vshrl.u32 %v478_v35, %v264_v8  ;;  %vm281_vm3 = vcmp.lt.s32.totalorder %v609_v21, 1 }
  0x4a   :  { %v208_v41 = vshll.u32 %v618_v30, 30  ;;  %vm283_vm4 = vcmp.lt.s32.totalorder %v609_v21, 3  ;;  %v289_v52 = vsel %vm281_vm3, %v268_v38, %v271_v42  ;;  %v293_v17 = vsel %vm281_vm3, %v271_v42, %v274_v44 }
  0x4b   :  { %v383_v36 = vadd.s32 4294967294, %v109_v26  ;;  %v291_v53 = vsel %vm283_vm4, %v274_v44, %v290_v50  ;;  %v294_v35 = vsel %vm284_vm0, %v280_v45, 1326507024  ;;  %vm282_vm5 = vcmp.lt.s32.totalorder %v609_v21, 2 }
  0x4c   :  { %v209_v47 = vsub.s32 %v205_v6, %v208_v41  ;;  %v286_v57 = vsel %vm284_vm0, %v274_v44, 2102212464  ;;  %v295_v59 = vsel %vm283_vm4, %v277_v34, %v294_v35  ;;  %v292_v0 = vsel %vm282_vm5, %v289_v52, %v291_v53 }
  0x4d   :  { %vm384_vm2 = vcmp.lt.s32.totalorder %v383_v36, 0  ;;  %v296_v1 = vsel %vm282_vm5, %v293_v17, %v295_v59  ;;  %v285_v4 = vsel %vm281_vm3, %v265_v48, %v268_v38  ;;  %v287_v7 = vsel %vm283_vm4, %v271_v42, %v286_v57 }
  0x4e   :  { %v112_v39 = vsel %vm384_vm2, 0, %v383_v36  ;;  %v211_v51 = vsub.s32 0, %v209_v47  ;;  %v653_v8 = vmul.u32.u64.low %v297_v46, %v296_v1  ;;  %v654_v14 = vmul.u32.u64.high %v297_v46, %v296_v1, %v653_v8 }
  0x4f   :  { %v113_v43 = vsub.s32 32, %v112_v39  ;;  %v117_v49 = vsub.s32 4294967266, %v112_v39  ;;  %v114_v18 = vshll.u32 %v105_v5, %v112_v39  ;;  %v127_v22 = vsub.s32 4, %v593_v60 }
  0x50   :  { %v386_v56 = vmin.u32 %v211_v51, %v209_v47  ;;  %v656_v6 = vmul.u32.u64.low %v297_v46, %v292_v0  ;;  %v657_v11 = vmul.u32.u64.high %v297_v46, %v292_v0, %v656_v6  ;;  %v288_v23 = vsel %vm282_vm5, %v285_v4, %v287_v7 }
  0x51   :  { %v115_v54 = vshrl.u32 %v97_v37, %v113_v43  ;;  %v118_v55 = vadd.s32 127, %v117_v49  ;;  %vm43_vm7 = vcmp.lt.s32.totalorder %v522_v9, 0  ;;  %v201_v25 = vadd.s32 %v589_v58, %v597_v62 }
  0x52   :  { %v213_v2 = vclz %v386_v56  ;;  %vm306_vm8 = vc.u32 %v654_v14, %v656_v6  ;;  %v307_v28 = vadd.s32 1, %v657_v11  ;;  %v128_v21 = vsel %vm43_vm7, %v127_v22, %v593_v60 }
  0x53   :  { %v116_v61 = vor.u32 %v115_v54, %v114_v18  ;;  %v119_v63 = vshll.u32 %v118_v55, 23  ;;  %v304_v31 = vmul.u32 %v297_v46, %v288_v23  ;;  %vm42_vm9 = vcmp.le.f32.partialorder %v41_v10, 0.7853982 }
  0x54   :  { %v387_v15 = vadd.s32 4294967294, %v213_v2  ;;  %v308_v38 = vsel %vm306_vm8, %v307_v28, %v657_v11  ;;  %v130_v44 = vsel %vm42_vm9, 0, %v128_v21  ;;  %v231_v48 = vsub.s32 4, %v618_v30 }
  0x55   :  { %v120_v5 = vor.u32 4788187, %v119_v63  ;;  %v123_v20 = vcvt.s32.f32 %v116_v61  ;;  %v309_v62 = vadd.s32 %v308_v38, %v304_v31  ;;  %v134_v46 = vadd.s32 3, %v130_v44 }
  0x56   :  { %vm388_vm6 = vcmp.lt.s32.totalorder %v387_v15, 0  ;;  %vm147_vm10 = vcmp.lt.s32.totalorder %v526_v12, 0  ;;  %vm685_vm11 = vcmp.le.f32.partialorder %v145_v16, 0.7853982  ;;  %vm133_vm15 = vweird.f32 %v522_v9 }
  0x57   :  { %v121_v19 = vand.u32 2147483647, %v120_v5  ;;  %v216_v24 = vsel %vm388_vm6, 0, %v387_v15  ;;  %v310_v60 = vadd.s32 536870912, %v309_v62  ;;  %v135_v49 = vand.u32 3, %v134_v46 }
  0x58   :  { %v217_v26 = vsub.s32 32, %v216_v24  ;;  %v221_v27 = vsub.s32 4294967266, %v216_v24  ;;  %v218_v33 = vshll.u32 %v209_v47, %v216_v24  ;;  %v232_v18 = vsel %vm147_vm10, %v231_v48, %v618_v30 }
  0x59   :  { %v124_v32 = vmul.f32 %v123_v20, %v121_v19  ;;  %v678_v50 = vshrl.u32 %v310_v60, 30  ;;  %vm140_vm12 = vcmp.eq.s32.totalorder %v135_v49, 2  ;;  %v234_v16 = vsel %vm685_vm11, 0, %v232_v18 }
  0x5a   :  { %v219_v34 = vshrl.u32 %v201_v25, %v217_v26  ;;  %v222_v36 = vadd.s32 127, %v221_v27  ;;  %vm137_vm13 = vcmp.eq.s32.totalorder %v135_v49, 0  ;;  %vm136_vm14 = vcmp.lt.s32.totalorder %v135_v49, 2 }
  0x5b   :  { %v125_v29 = vxor.u32 2147483648, %v124_v32  ;;  %v312_v10 = vshll.u32 %v678_v50, 30  ;;  %v238_v2 = vadd.s32 3, %v234_v16  ;;  %v305_v7 = vadd.s32 %v656_v6, %v654_v14 }
  0x5c   :  { %v220_v41 = vor.u32 %v219_v34, %v218_v33  ;;  %v223_v42 = vshll.u32 %v222_v36, 23  ;;  %vm237_vm5 = vweird.f32 %v526_v12  ;;  %v335_v34 = vsub.s32 4, %v678_v50 }
  0x5d   :  { %v126_v58 = vsel %vm43_vm7, %v125_v29, %v124_v32  ;;  %v313_v43 = vsub.s32 %v309_v62, %v312_v10  ;;  %v239_v11 = vand.u32 3, %v238_v2  ;;  %vm251_vm6 = vcmp.lt.s32.totalorder %v528_v13, 0 }
  0x5e   :  { %v129_v40 = vsel %vm42_vm9, %v522_v9, %v126_v58  ;;  %v224_v45 = vor.u32 4788187, %v223_v42  ;;  %v227_v39 = vcvt.s32.f32 %v220_v41  ;;  %vm250_vm7 = vcmp.le.f32.partialorder %v249_v3, 0.7853982 }
  0x5f   :  { %416 = vcosq.f32 %v129_v40  ;;  %v315_v52 = vsub.s32 0, %v313_v43  ;;  %vm244_vm2 = vcmp.eq.s32.totalorder %v239_v11, 2  ;;  %vm241_vm3 = vcmp.eq.s32.totalorder %v239_v11, 0 }
  0x60   :  { %418 = vsinq.f32 %v129_v40  ;;  %v225_v37 = vand.u32 2147483647, %v224_v45  ;;  %vm240_vm4 = vcmp.lt.s32.totalorder %v239_v11, 2  ;;  %v336_v58 = vsel %vm251_vm6, %v335_v34, %v678_v50 }
  0x61   :  { %v390_v35 = vmin.u32 %v315_v52, %v313_v43  ;;  %v338_v62 = vsel %vm250_vm7, 0, %v336_v58 }
  0x62   :  { %v228_v47 = vmul.f32 %v227_v39, %v225_v37  ;;  %v342_v40 = vadd.s32 3, %v338_v62 }
  0x63   :  { %v317_v61 = vclz %v390_v35 }
  0x64   :  { %v229_v51 = vxor.u32 2147483648, %v228_v47  ;;  %v343_v41 = vand.u32 3, %v342_v40 }
  0x65   :  { %v391_v0 = vadd.s32 4294967294, %v317_v61 }
  0x66   :  { %v230_v17 = vsel %vm147_vm10, %v229_v51, %v228_v47  ;;  %vm348_vm8 = vcmp.eq.s32.totalorder %v343_v41, 2  ;;  %vm345_vm9 = vcmp.eq.s32.totalorder %v343_v41, 0  ;;  %vm344_vm10 = vcmp.lt.s32.totalorder %v343_v41, 2 }
  0x67   :  { %v233_v55 = vsel %vm685_vm11, %v526_v12, %v230_v17  ;;  %vm392_vm0 = vcmp.lt.s32.totalorder %v391_v0, 0  ;;  %vm341_vm11 = vweird.f32 %v528_v13 }
  0x68   :  { %420 = vcosq.f32 %v233_v55  ;;  %v320_v5 = vsel %vm392_vm0, 0, %v391_v0 }
  0x69   :  { %v417_v54 = vpop.eup %416  ;;  %422 = vsinq.f32 %v233_v55  ;;  %v321_v8 = vsub.s32 32, %v320_v5  ;;  %v325_v15 = vsub.s32 4294967266, %v320_v5  ;;  %v322_v19 = vshll.u32 %v313_v43, %v320_v5 }
  0x6a   :  { %v419_v56 = vpop.eup %418  ;;  %v141_v57 = vxor.u32 2147483648, %v417_v54 }
  0x6b   :  { %v138_v59 = vxor.u32 2147483648, %v419_v56  ;;  %v323_v20 = vshrl.u32 %v305_v7, %v321_v8  ;;  %v326_v22 = vadd.s32 127, %v325_v15 }
  0x6c   :  { %v142_v63 = vsel %vm140_vm12, %v141_v57, %v419_v56 }
  0x6d   :  { %v139_v30 = vsel %vm137_vm13, %v417_v54, %v138_v59  ;;  %v324_v9 = vor.u32 %v323_v20, %v322_v19  ;;  %v327_v25 = vshll.u32 %v326_v22, 23 }
  0x6e   :  { %v143_v1 = vsel %vm136_vm14, %v139_v30, %v142_v63 }
  0x6f   :  { %v144_v4 = vsel %vm133_vm15, nan, %v143_v1  ;;  %v328_v28 = vor.u32 4788187, %v327_v25  ;;  %v331_v21 = vcvt.s32.f32 %v324_v9 }
  0x70   :  { %355 = vst.msk [vmem:[#allocation6 + $0x3] sm:$0xff] %vm354_vm1, %v144_v4 }
  0x71   :  { %v329_v6 = vand.u32 2147483647, %v328_v28 }
  0x72   :  { %v421_v23 = vpop.eup %420 }
  0x73   :  { %v423_v32 = vpop.eup %422  ;;  %v245_v24 = vxor.u32 2147483648, %v421_v23  ;;  %v332_v33 = vmul.f32 %v331_v21, %v329_v6 }
  0x74   :  { %v242_v26 = vxor.u32 2147483648, %v423_v32 }
  0x75   :  { %v246_v27 = vsel %vm244_vm2, %v245_v24, %v423_v32  ;;  %v333_v36 = vxor.u32 2147483648, %v332_v33 }
  0x76   :  { %v243_v29 = vsel %vm241_vm3, %v421_v23, %v242_v26 }
  0x77   :  { %v247_v14 = vsel %vm240_vm4, %v243_v29, %v246_v27  ;;  %v334_v38 = vsel %vm251_vm6, %v333_v36, %v332_v33 }
  0x78   :  { %v248_v31 = vsel %vm237_vm5, nan, %v247_v14  ;;  %v337_v12 = vsel %vm250_vm7, %v528_v13, %v334_v38 }
  0x79   :  { %356 = vst.msk [vmem:[#allocation6 + $0xb] sm:$0xff] %vm354_vm1, %v248_v31  ;;  %424 = vcosq.f32 %v337_v12 }
  0x7a   :  { %426 = vsinq.f32 %v337_v12 }
  0x83   :  { %v425_v42 = vpop.eup %424 }
  0x84   :  { %v427_v44 = vpop.eup %426  ;;  %v349_v60 = vxor.u32 2147483648, %v425_v42 }
  0x85   :  { %v346_v45 = vxor.u32 2147483648, %v427_v44 }
  0x86   :  { %v350_v46 = vsel %vm348_vm8, %v349_v60, %v427_v44 }
  0x87   :  { %v347_v3 = vsel %vm345_vm9, %v425_v42, %v346_v45 }
  0x88   :  { %v351_v50 = vsel %vm344_vm10, %v347_v3, %v350_v46 }
  0x89   :  { %v352_v37 = vsel %vm341_vm11, nan, %v351_v50 }
  0x8a   :  { %357 = vst.msk [vmem:[#allocation6 + $0x13] sm:$0xff] %vm354_vm1, %v352_v37 }
  0x8b   :  { %461 = shalt.err (!%p458_p12)
}
  0x8c   :  { %s462_s22 = scalar_lea.hbm %s722_s1, 1024 }
  0x8d   :  { %p463_p13 = scmp.ne.s32.totalorder %s722_s1, %s462_s22  ;;  %p466_p0 = scmp.lt.u32.totalorder %s462_s22, %s722_s1 }
  0x8f   :  { %p468_p1 = pnand %p466_p0, %p463_p13 }
  0x91   :  { %471 = shalt.err (!%p468_p1)
}
  0x92   :  { %s485_s27 = smov 128   ;;  %s486_s28 = smov 8  }
  0x93   :  { %375 = dma.vmem_to_hbm [thread:$0]  %s370_s18, 1024, %s722_s1, [#allocation5], %s485_s27, %s485_s27, %s486_s28  }
  0x94   :  { %474 = dma.done.wait [#allocation5], 1024  }
  0x95   :  { %475 = vsyncadd [#allocation5], 4294966272 }
  0x96   :  { %379 = vsyncpa [#allocation4], 1 }
  0x97   :  { %380 = vsyncpa [#allocation5], 1 }

</bundles_post_ra>
